<compile_context>
chip_gen: v7x
topology: tpu7x:2x2x1
jax: 0.10.0
libtpu: 0.0.40
codegen_flags: <defaults>
</compile_context>

<pallas_src>
import jax
import jax.numpy as jnp
from jax import lax
from jax.experimental import pallas as pl
from jax.experimental.pallas import tpu as pltpu


def basic_block_kernel(x_ref, w1_ref, b1_ref, w2_ref, b2_ref, o_ref):
    # x_ref / o_ref block: (B_tile, C, L) in NCL; weights: (C, 3C); biases: (C, 1)
    B, C, L = x_ref.shape

    # Boundary masks along L (lane axis), built once and reused everywhere.
    col = lax.broadcasted_iota(jnp.int32, (1, L), 1)
    prev_ok = col >= 1          # position l has a valid l-1 neighbour
    next_ok = col < (L - 1)     # position l has a valid l+1 neighbour

    w1 = w1_ref[...]            # (C, 3C), BN1 scale already folded in
    w2 = w2_ref[...]            # (C, 3C), BN2 scale already folded in
    b1 = b1_ref[...]            # (C, 1)
    b2 = b2_ref[...]            # (C, 1)

    def conv3(t, w):
        # t: (Cin, L).  Build the (3*Cin, L) tap stack with two lane rotations
        # (non-negative shifts only) + masks, then ONE K=3*Cin MXU matmul.
        t_prev = jnp.where(prev_ok, pltpu.roll(t, shift=1, axis=1), 0.0)
        t_next = jnp.where(next_ok, pltpu.roll(t, shift=L - 1, axis=1), 0.0)
        t_stk = jnp.concatenate([t_prev, t, t_next], axis=0)          # (3C, L)
        return jnp.dot(w, t_stk, preferred_element_type=jnp.float32)  # (C, L)

    def body(b, carry):
        x = x_ref[b]                                   # (C, L) f32
        y = jnp.maximum(conv3(x, w1) + b1, 0.0)        # conv1 -> bn1 -> relu
        y = conv3(y, w2) + b2                          # conv2 -> bn2
        o_ref[b] = jnp.maximum(y + x, 0.0).astype(o_ref.dtype)  # +identity, relu
        return carry

    lax.fori_loop(0, B, body, None, unroll=True)


def basic_block(x_ncl, w1, bn1, w2, bn2, *, batch_tile=None):
    """x_ncl: (N, C, L) f32.  w1/w2: (3, Cin, Cout) with w_torch[co, ci, k] == w[k, ci, co].
    bn1/bn2: dicts with gamma/beta/mean/var (eval-mode BatchNorm)."""
    N, C, L = x_ncl.shape
    eps = 1e-5

    def fold(w, bn):
        scale = bn["gamma"] / jnp.sqrt(bn["var"] + eps)             # (Cout,)
        bias = (bn["beta"] - bn["mean"] * scale).reshape(-1, 1)     # (Cout, 1)
        w_scaled = w * scale[None, None, :]                         # fold BN scale into conv
        # (3, Cin, Cout) -> (Cout, 3*Cin), k-major along K to match the tap-stack order
        w_stk = jnp.transpose(w_scaled, (2, 0, 1)).reshape(C, 3 * C)
        return w_stk.astype(jnp.float32), bias.astype(jnp.float32)

    w1s, b1 = fold(w1, bn1)
    w2s, b2 = fold(w2, bn2)

    if batch_tile is None:
        batch_tile = N                     # whole batch per step at small shapes
    assert N % batch_tile == 0, "batch_tile must divide N"
    grid = (N // batch_tile,)

    # NOTE: weight/bias index_maps are constant; on VMEM-tight chips (v7x) they
    # could additionally use pipeline_mode=pl.Buffered(1) to skip double-buffering.
    out = pl.pallas_call(
        basic_block_kernel,
        out_shape=jax.ShapeDtypeStruct((N, C, L), jnp.float32),
        grid_spec=pltpu.PrefetchScalarGridSpec(
            num_scalar_prefetch=0,
            grid=grid,
            in_specs=[
                pl.BlockSpec((batch_tile, C, L), lambda n: (n, 0, 0)),  # x (NCL)
                pl.BlockSpec((C, 3 * C), lambda n: (0, 0)),             # w1 (scale-folded, tap-stacked)
                pl.BlockSpec((C, 1), lambda n: (0, 0)),                 # bn1 bias
                pl.BlockSpec((C, 3 * C), lambda n: (0, 0)),             # w2
                pl.BlockSpec((C, 1), lambda n: (0, 0)),                 # bn2 bias
            ],
            out_specs=pl.BlockSpec((batch_tile, C, L), lambda n: (n, 0, 0)),
        ),
        compiler_params=pltpu.CompilerParams(
            dimension_semantics=("parallel",),
        ),
    )(x_ncl, w1s, b1, w2s, b2)
    return out


def _reference(x_ncl, w1, bn1, w2, bn2):
    """Pure-JAX reference of the PyTorch forward (eval-mode BN, stride=1)."""
    eps = 1e-5

    def conv(x, w):
        # w is (3, Cin, Cout) -> lax wants (Cout, Cin, 3)
        wk = jnp.transpose(w, (2, 1, 0))
        return lax.conv_general_dilated(
            x, wk, window_strides=(1,), padding=((1, 1),),
            dimension_numbers=("NCH", "OIH", "NCH"))

    def bn(x, p):
        scale = (p["gamma"] / jnp.sqrt(p["var"] + eps)).reshape(1, -1, 1)
        bias = (p["beta"] - p["mean"] * p["gamma"] / jnp.sqrt(p["var"] + eps)).reshape(1, -1, 1)
        return x * scale + bias

    out = jnp.maximum(bn(conv(x_ncl, w1), bn1), 0.0)
    out = bn(conv(out, w2), bn2)
    out = jnp.maximum(out + x_ncl, 0.0)
    return out


if __name__ == "__main__":
    key = jax.random.PRNGKey(0)
    k_x, k_w1, k_w2, k_g1, k_b1, k_g2, k_b2, k_m1, k_m2 = jax.random.split(key, 9)

    N, C, L = 2, 8, 16           # inplanes == planes == 8, stride=1, no downsample
    x = jax.random.normal(k_x, (N, C, L), dtype=jnp.float32)

    # conv weights in (k, Cin, Cout) layout (w_torch[co, ci, k] == w[k, ci, co])
    w1 = 0.1 * jax.random.normal(k_w1, (3, C, C), dtype=jnp.float32)
    w2 = 0.1 * jax.random.normal(k_w2, (3, C, C), dtype=jnp.float32)

    bn1 = dict(
        gamma=1.0 + 0.1 * jax.random.normal(k_g1, (C,), dtype=jnp.float32),
        beta=0.1 * jax.random.normal(k_b1, (C,), dtype=jnp.float32),
        mean=0.05 * jax.random.normal(k_m1, (C,), dtype=jnp.float32),
        var=jnp.abs(1.0 + 0.1 * jax.random.normal(k_g2, (C,), dtype=jnp.float32)),
    )
    bn2 = dict(
        gamma=1.0 + 0.1 * jax.random.normal(k_g2, (C,), dtype=jnp.float32),
        beta=0.1 * jax.random.normal(k_b2, (C,), dtype=jnp.float32),
        mean=0.05 * jax.random.normal(k_m2, (C,), dtype=jnp.float32),
        var=jnp.abs(1.0 + 0.1 * jax.random.normal(k_b1, (C,), dtype=jnp.float32)),
    )

    out = jax.block_until_ready(basic_block(x, w1, bn1, w2, bn2))
    ref = jax.block_until_ready(_reference(x, w1, bn1, w2, bn2))

    assert out.shape == (N, C, L)
    assert jnp.allclose(out, ref, atol=1e-4, rtol=1e-4), float(jnp.max(jnp.abs(out - ref)))
    print("KERNEL_OK")
</pallas_src>

<mosaic_0001>
module attributes {stable_mosaic.version = 11 : i64} {
  func.func @basic_block_kernel(%arg0: i32, %arg1: memref<2x8x16xf32, #tpu.memory_space<vmem>>, %arg2: memref<8x24xf32, #tpu.memory_space<vmem>>, %arg3: memref<8x1xf32, #tpu.memory_space<vmem>>, %arg4: memref<8x24xf32, #tpu.memory_space<vmem>>, %arg5: memref<8x1xf32, #tpu.memory_space<vmem>>, %arg6: memref<2x8x16xf32, #tpu.memory_space<vmem>>) attributes {dimension_semantics = [#tpu.dimension_semantics<parallel>], iteration_bounds = array<i64: 1>, scalar_prefetch = 0 : i64, scratch_operands = 0 : i64, tpu.core_type = #tpu.core_type<tc>, window_params = [{transform_indices = @transform_0, window_bounds = array<i64: 2, 8, 16>}, {pipeline_mode = #tpu.pipeline_mode<synchronous>, transform_indices = @transform_1, window_bounds = array<i64: 8, 24>}, {pipeline_mode = #tpu.pipeline_mode<synchronous>, transform_indices = @transform_2, window_bounds = array<i64: 8, 1>}, {pipeline_mode = #tpu.pipeline_mode<synchronous>, transform_indices = @transform_3, window_bounds = array<i64: 8, 24>}, {pipeline_mode = #tpu.pipeline_mode<synchronous>, transform_indices = @transform_4, window_bounds = array<i64: 8, 1>}, {transform_indices = @transform_5, window_bounds = array<i64: 2, 8, 16>}]} {
    %0 = tpu.iota {dimensions = array<i32: 1>} : vector<1x16xi32>
    %c1_i32 = arith.constant 1 : i32
    %1 = vector.broadcast %c1_i32 : i32 to vector<1x16xi32>
    %2 = arith.cmpi sge, %0, %1 : vector<1x16xi32>
    %c15_i32 = arith.constant 15 : i32
    %3 = vector.broadcast %c15_i32 : i32 to vector<1x16xi32>
    %4 = arith.cmpi slt, %0, %3 : vector<1x16xi32>
    %c0 = arith.constant 0 : index
    %c0_0 = arith.constant 0 : index
    %5 = vector.load %arg2[%c0, %c0_0] : memref<8x24xf32, #tpu.memory_space<vmem>>, vector<8x24xf32>
    %c0_1 = arith.constant 0 : index
    %c0_2 = arith.constant 0 : index
    %6 = vector.load %arg4[%c0_1, %c0_2] : memref<8x24xf32, #tpu.memory_space<vmem>>, vector<8x24xf32>
    %c0_3 = arith.constant 0 : index
    %c0_4 = arith.constant 0 : index
    %7 = vector.load %arg3[%c0_3, %c0_4] : memref<8x1xf32, #tpu.memory_space<vmem>>, vector<8x1xf32>
    %c0_5 = arith.constant 0 : index
    %c0_6 = arith.constant 0 : index
    %8 = vector.load %arg5[%c0_5, %c0_6] : memref<8x1xf32, #tpu.memory_space<vmem>>, vector<8x1xf32>
    %c0_i32 = arith.constant 0 : i32
    %9 = arith.index_cast %c0_i32 : i32 to index
    %c0_7 = arith.constant 0 : index
    %c0_8 = arith.constant 0 : index
    %10 = vector.load %arg1[%9, %c0_7, %c0_8] : memref<2x8x16xf32, #tpu.memory_space<vmem>>, vector<1x8x16xf32>
    %11 = vector.shape_cast %10 : vector<1x8x16xf32> to vector<8x16xf32>
    %c1_i32_9 = arith.constant 1 : i32
    %12 = tpu.dynamic_rotate %11 by %c1_i32_9 dim 1 : vector<8x16xf32>, i32 -> vector<8x16xf32>
    %cst = arith.constant 0.000000e+00 : f32
    %13 = vector.shape_cast %2 : vector<1x16xi1> to vector<1x16xi1>
    %14 = vector.broadcast %13 : vector<1x16xi1> to vector<8x16xi1>
    %15 = vector.broadcast %cst : f32 to vector<8x16xf32>
    %16 = arith.select %14, %12, %15 : vector<8x16xi1>, vector<8x16xf32>
    %c15_i32_10 = arith.constant 15 : i32
    %17 = tpu.dynamic_rotate %11 by %c15_i32_10 dim 1 : vector<8x16xf32>, i32 -> vector<8x16xf32>
    %cst_11 = arith.constant 0.000000e+00 : f32
    %18 = vector.shape_cast %4 : vector<1x16xi1> to vector<1x16xi1>
    %19 = vector.broadcast %18 : vector<1x16xi1> to vector<8x16xi1>
    %20 = vector.broadcast %cst_11 : f32 to vector<8x16xf32>
    %21 = arith.select %19, %17, %20 : vector<8x16xi1>, vector<8x16xf32>
    %22 = tpu.concatenate %16, %11, %21 in 0 : vector<8x16xf32>, vector<8x16xf32>, vector<8x16xf32> -> vector<24x16xf32>
    %cst_12 = arith.constant dense<0.000000e+00> : vector<8x16xf32>
    %23 = tpu.matmul %5, %22, %cst_12 {dimension_numbers = #tpu.dot_dimension_numbers<[1], [0], [0], [1], [0, 0, 1, 1], [], []>} : vector<8x24xf32>, vector<24x16xf32>, vector<8x16xf32> -> vector<8x16xf32>
    %24 = vector.broadcast %7 : vector<8x1xf32> to vector<8x16xf32>
    %25 = arith.addf %23, %24 : vector<8x16xf32>
    %cst_13 = arith.constant 0.000000e+00 : f32
    %26 = vector.broadcast %cst_13 : f32 to vector<8x16xf32>
    %27 = arith.maximumf %25, %26 : vector<8x16xf32>
    %c1_i32_14 = arith.constant 1 : i32
    %28 = tpu.dynamic_rotate %27 by %c1_i32_14 dim 1 : vector<8x16xf32>, i32 -> vector<8x16xf32>
    %cst_15 = arith.constant 0.000000e+00 : f32
    %29 = vector.shape_cast %2 : vector<1x16xi1> to vector<1x16xi1>
    %30 = vector.broadcast %29 : vector<1x16xi1> to vector<8x16xi1>
    %31 = vector.broadcast %cst_15 : f32 to vector<8x16xf32>
    %32 = arith.select %30, %28, %31 : vector<8x16xi1>, vector<8x16xf32>
    %c15_i32_16 = arith.constant 15 : i32
    %33 = tpu.dynamic_rotate %27 by %c15_i32_16 dim 1 : vector<8x16xf32>, i32 -> vector<8x16xf32>
    %cst_17 = arith.constant 0.000000e+00 : f32
    %34 = vector.shape_cast %4 : vector<1x16xi1> to vector<1x16xi1>
    %35 = vector.broadcast %34 : vector<1x16xi1> to vector<8x16xi1>
    %36 = vector.broadcast %cst_17 : f32 to vector<8x16xf32>
    %37 = arith.select %35, %33, %36 : vector<8x16xi1>, vector<8x16xf32>
    %38 = tpu.concatenate %32, %27, %37 in 0 : vector<8x16xf32>, vector<8x16xf32>, vector<8x16xf32> -> vector<24x16xf32>
    %cst_18 = arith.constant dense<0.000000e+00> : vector<8x16xf32>
    %39 = tpu.matmul %6, %38, %cst_18 {dimension_numbers = #tpu.dot_dimension_numbers<[1], [0], [0], [1], [0, 0, 1, 1], [], []>} : vector<8x24xf32>, vector<24x16xf32>, vector<8x16xf32> -> vector<8x16xf32>
    %40 = vector.broadcast %8 : vector<8x1xf32> to vector<8x16xf32>
    %41 = arith.addf %39, %40 : vector<8x16xf32>
    %42 = arith.addf %41, %11 : vector<8x16xf32>
    %cst_19 = arith.constant 0.000000e+00 : f32
    %43 = vector.broadcast %cst_19 : f32 to vector<8x16xf32>
    %44 = arith.maximumf %42, %43 : vector<8x16xf32>
    %45 = arith.index_cast %c0_i32 : i32 to index
    %c0_20 = arith.constant 0 : index
    %c0_21 = arith.constant 0 : index
    %46 = vector.load %arg6[%45, %c0_20, %c0_21] : memref<2x8x16xf32, #tpu.memory_space<vmem>>, vector<1x8x16xf32>
    %47 = vector.shape_cast %46 : vector<1x8x16xf32> to vector<8x16xf32>
    %48 = vector.shape_cast %44 : vector<8x16xf32> to vector<1x8x16xf32>
    tpu.vector_store %arg6[%45, %c0_20, %c0_21], %48 {strides = array<i32>} : memref<2x8x16xf32, #tpu.memory_space<vmem>>, vector<1x8x16xf32>,
    %c1_i32_22 = arith.constant 1 : i32
    %49 = arith.index_cast %c1_i32_22 : i32 to index
    %c0_23 = arith.constant 0 : index
    %c0_24 = arith.constant 0 : index
    %50 = vector.load %arg1[%49, %c0_23, %c0_24] : memref<2x8x16xf32, #tpu.memory_space<vmem>>, vector<1x8x16xf32>
    %51 = vector.shape_cast %50 : vector<1x8x16xf32> to vector<8x16xf32>
    %c1_i32_25 = arith.constant 1 : i32
    %52 = tpu.dynamic_rotate %51 by %c1_i32_25 dim 1 : vector<8x16xf32>, i32 -> vector<8x16xf32>
    %cst_26 = arith.constant 0.000000e+00 : f32
    %53 = vector.shape_cast %2 : vector<1x16xi1> to vector<1x16xi1>
    %54 = vector.broadcast %53 : vector<1x16xi1> to vector<8x16xi1>
    %55 = vector.broadcast %cst_26 : f32 to vector<8x16xf32>
    %56 = arith.select %54, %52, %55 : vector<8x16xi1>, vector<8x16xf32>
    %c15_i32_27 = arith.constant 15 : i32
    %57 = tpu.dynamic_rotate %51 by %c15_i32_27 dim 1 : vector<8x16xf32>, i32 -> vector<8x16xf32>
    %cst_28 = arith.constant 0.000000e+00 : f32
    %58 = vector.shape_cast %4 : vector<1x16xi1> to vector<1x16xi1>
    %59 = vector.broadcast %58 : vector<1x16xi1> to vector<8x16xi1>
    %60 = vector.broadcast %cst_28 : f32 to vector<8x16xf32>
    %61 = arith.select %59, %57, %60 : vector<8x16xi1>, vector<8x16xf32>
    %62 = tpu.concatenate %56, %51, %61 in 0 : vector<8x16xf32>, vector<8x16xf32>, vector<8x16xf32> -> vector<24x16xf32>
    %cst_29 = arith.constant dense<0.000000e+00> : vector<8x16xf32>
    %63 = tpu.matmul %5, %62, %cst_29 {dimension_numbers = #tpu.dot_dimension_numbers<[1], [0], [0], [1], [0, 0, 1, 1], [], []>} : vector<8x24xf32>, vector<24x16xf32>, vector<8x16xf32> -> vector<8x16xf32>
    %64 = vector.broadcast %7 : vector<8x1xf32> to vector<8x16xf32>
    %65 = arith.addf %63, %64 : vector<8x16xf32>
    %cst_30 = arith.constant 0.000000e+00 : f32
    %66 = vector.broadcast %cst_30 : f32 to vector<8x16xf32>
    %67 = arith.maximumf %65, %66 : vector<8x16xf32>
    %c1_i32_31 = arith.constant 1 : i32
    %68 = tpu.dynamic_rotate %67 by %c1_i32_31 dim 1 : vector<8x16xf32>, i32 -> vector<8x16xf32>
    %cst_32 = arith.constant 0.000000e+00 : f32
    %69 = vector.shape_cast %2 : vector<1x16xi1> to vector<1x16xi1>
    %70 = vector.broadcast %69 : vector<1x16xi1> to vector<8x16xi1>
    %71 = vector.broadcast %cst_32 : f32 to vector<8x16xf32>
    %72 = arith.select %70, %68, %71 : vector<8x16xi1>, vector<8x16xf32>
    %c15_i32_33 = arith.constant 15 : i32
    %73 = tpu.dynamic_rotate %67 by %c15_i32_33 dim 1 : vector<8x16xf32>, i32 -> vector<8x16xf32>
    %cst_34 = arith.constant 0.000000e+00 : f32
    %74 = vector.shape_cast %4 : vector<1x16xi1> to vector<1x16xi1>
    %75 = vector.broadcast %74 : vector<1x16xi1> to vector<8x16xi1>
    %76 = vector.broadcast %cst_34 : f32 to vector<8x16xf32>
    %77 = arith.select %75, %73, %76 : vector<8x16xi1>, vector<8x16xf32>
    %78 = tpu.concatenate %72, %67, %77 in 0 : vector<8x16xf32>, vector<8x16xf32>, vector<8x16xf32> -> vector<24x16xf32>
    %cst_35 = arith.constant dense<0.000000e+00> : vector<8x16xf32>
    %79 = tpu.matmul %6, %78, %cst_35 {dimension_numbers = #tpu.dot_dimension_numbers<[1], [0], [0], [1], [0, 0, 1, 1], [], []>} : vector<8x24xf32>, vector<24x16xf32>, vector<8x16xf32> -> vector<8x16xf32>
    %80 = vector.broadcast %8 : vector<8x1xf32> to vector<8x16xf32>
    %81 = arith.addf %79, %80 : vector<8x16xf32>
    %82 = arith.addf %81, %51 : vector<8x16xf32>
    %cst_36 = arith.constant 0.000000e+00 : f32
    %83 = vector.broadcast %cst_36 : f32 to vector<8x16xf32>
    %84 = arith.maximumf %82, %83 : vector<8x16xf32>
    %85 = arith.index_cast %c1_i32_22 : i32 to index
    %c0_37 = arith.constant 0 : index
    %c0_38 = arith.constant 0 : index
    %86 = vector.load %arg6[%85, %c0_37, %c0_38] : memref<2x8x16xf32, #tpu.memory_space<vmem>>, vector<1x8x16xf32>
    %87 = vector.shape_cast %86 : vector<1x8x16xf32> to vector<8x16xf32>
    %88 = vector.shape_cast %84 : vector<8x16xf32> to vector<1x8x16xf32>
    tpu.vector_store %arg6[%85, %c0_37, %c0_38], %88 {strides = array<i32>} : memref<2x8x16xf32, #tpu.memory_space<vmem>>, vector<1x8x16xf32>,
    %c2_i32 = arith.constant 2 : i32
    return
  }
  func.func @transform_0(%arg0: i32) -> (i32, i32, i32) {
    %c0_i32 = arith.constant 0 : i32
    %c0_i32_0 = arith.constant 0 : i32
    %c0_i32_1 = arith.constant 0 : i32
    return %arg0, %c0_i32, %c0_i32_0 : i32, i32, i32
  }
  func.func @transform_1(%arg0: i32) -> (i32, i32) {
    %c0_i32 = arith.constant 0 : i32
    %c0_i32_0 = arith.constant 0 : i32
    %c0_i32_1 = arith.constant 0 : i32
    return %c0_i32, %c0_i32_0 : i32, i32
  }
  func.func @transform_2(%arg0: i32) -> (i32, i32) {
    %c0_i32 = arith.constant 0 : i32
    %c0_i32_0 = arith.constant 0 : i32
    %c0_i32_1 = arith.constant 0 : i32
    return %c0_i32, %c0_i32_0 : i32, i32
  }
  func.func @transform_3(%arg0: i32) -> (i32, i32) {
    %c0_i32 = arith.constant 0 : i32
    %c0_i32_0 = arith.constant 0 : i32
    %c0_i32_1 = arith.constant 0 : i32
    return %c0_i32, %c0_i32_0 : i32, i32
  }
  func.func @transform_4(%arg0: i32) -> (i32, i32) {
    %c0_i32 = arith.constant 0 : i32
    %c0_i32_0 = arith.constant 0 : i32
    %c0_i32_1 = arith.constant 0 : i32
    return %c0_i32, %c0_i32_0 : i32, i32
  }
  func.func @transform_5(%arg0: i32) -> (i32, i32, i32) {
    %c0_i32 = arith.constant 0 : i32
    %c0_i32_0 = arith.constant 0 : i32
    %c0_i32_1 = arith.constant 0 : i32
    return %arg0, %c0_i32, %c0_i32_0 : i32, i32, i32
  }
}

</mosaic_0001>

<bundles_post_ra>
// kernel: tpu_custom_call.1
= control target key start
LH: loop header
LB: loop body
LE: loop exit
PB: predicated region body
PF: predicated region fallthrough
CT: control target
= control target key end

     0   :  { %10 = vsyncpa [#allocation3], 0  ;;  %s738_s0 = inlined_call_operand.vmem [shape: f32[2,8,16], index: 0, kind: input, shape index: {}]   ;;  %s739_s1 = inlined_call_operand.hbm [shape: f32[8,24], index: 1, kind: input, shape index: {}]   ;;  %s740_s2 = inlined_call_operand.vmem [shape: f32[8,1], index: 2, kind: input, shape index: {}]   ;;  %s741_s3 = inlined_call_operand.vmem [shape: f32[8,24], index: 3, kind: input, shape index: {}]   ;;  %s742_s4 = inlined_call_operand.vmem [shape: f32[8,1], index: 4, kind: input, shape index: {}]   ;;  %s743_s5 = inlined_call_operand.hbm [shape: f32[2,8,16], index: 5, kind: output, shape index: {}]  }
   0x1   :  { %11 = vsyncpa [#allocation4], 0  ;;  %s575_s18 = smov [#allocation2]   ;;  %s527_s22 = scalar_lea.hbm %s739_s1, 128 }
   0x2   :  { %s20_s19 = sshll.u32 %s575_s18, 4  ;;  %p528_p0 = scmp.ne.s32.totalorder %s739_s1, %s527_s22  ;;  %s21_s19 = int_to_ptr.vmem [resolvable:$true] %s20_s19 }
   0x3   :  { %p531_p1 = scmp.lt.u32.totalorder %s527_s22, %s739_s1 }
   0x5   :  { %p533_p2 = pnand %p531_p1, %p528_p0 }
   0x7   :  { %536 = shalt.err (!%p533_p2)
}
   0x8   :  { %s537_s27 = scalar_lea.vmem %s21_s19, 128  ;;  %p542_p4 = scmp.lt.s32.totalorder %s21_s19, %s21_s19 }
   0x9   :  { %p538_p3 = scmp.ne.s32.totalorder %s21_s19, %s537_s27  ;;  %p543_p5 = scmp.lt.s32.totalorder %s537_s27, %s537_s27 }
   0xb   :  { %p544_p6 = por %p543_p5, %p542_p4 }
   0xd   :  { %p545_p7 = pnand %p544_p6, %p538_p3 }
   0xf   :  { %548 = shalt.err (!%p545_p7)
}
  0x10   :  { %23 = dma.hbm_to_vmem [thread:$0]  %s739_s1, 128, %s21_s19, [#allocation3]  }
  0x11   :  { %571 = dma.done.wait [#allocation3], 128  }
  0x12   :  { %572 = vsyncadd [#allocation3], 4294967168  ;;  %v632_v0 = vld [vmem:[%s738_s0] sm:$0xff]  ;;  %s576_s7 = smov 16   ;;  %v639_v1 = vld [vmem:[%s738_s0 + $0x8] sm:$0xff]  ;;  %vm42_vm0 = vcmask 1047680   ;;  %v33_v14 = vlaneseq }
  0x13   :  { %43 = vrot.lane.b32.xlu0 %v632_v0, %s576_s7  ;;  %v577_v6 = vmov 0.0|0.0   ;;  %vm578_vm1 = vmmov 0   ;;  %v579_v7 = vmov 0.0   ;;  %s580_s0 = smov 113   ;;  %s581_s1 = smov 127   ;;  %v582_v10 = vmov 0  }
  0x14   :  { %498 = vmatprep.subr.bf16.mxu0 %v577_v6  ;;  %502 = vmatprep.subr.bf16.mxu1 %v577_v6  ;;  %v39_v13 = vld [vmem:[%s740_s2] sm:$0xff]  ;;  %v666_v15 = vand.u32 127, %v33_v14  ;;  %vm583_vm3 = vmmov 1   ;;  %vm67_vm6 = vcmask 195584   ;;  %vm237_vm7 = vcmask 130048  }
  0x15   :  { %468 = vmatprep.mubr.msk.f32.mxu0 %vm578_vm1, %v579_v7  ;;  %477 = vmatprep.mubr.msk.f32.mxu1 %vm578_vm1, %v579_v7  ;;  %v37_v21 = vld [vmem:[#allocation2] sm:$0xff] }
  0x16   :  { %526 = vset.pattern.permute.xlu0 %v582_v10  ;;  %vm35_vm2 = vcmp.ge.s32.totalorder %v666_v15, 1  ;;  %vm36_vm5 = vcmp.lt.s32.totalorder %v666_v15, 15  ;;  %v40_v41 = vld [vmem:[%s742_s4] sm:$0xff] }
  0x17   :  { %241 = vrot.lane.b32.xlu0 %v639_v1, %s576_s7  ;;  %vm669_vm4 = vmpackc.low %vm583_vm3, %vm35_vm2  ;;  %v38_v44 = vld [vmem:[%s741_s3] sm:$0xff]  ;;  %s584_s3 = smov [#allocation5]  }
  0x18   :  { %s421_s4 = sshll.u32 %s584_s3, 4  ;;  %s422_s4 = int_to_ptr.vmem [resolvable:$true] %s421_s4 }
  0x19   :  { %s549_s15 = scalar_lea.vmem %s422_s4, 256  ;;  %p554_p9 = scmp.lt.s32.totalorder %s422_s4, %s422_s4 }
  0x1a   :  { %p550_p8 = scmp.ne.s32.totalorder %s422_s4, %s549_s15  ;;  %p555_p10 = scmp.lt.s32.totalorder %s549_s15, %s549_s15 }
  0x1c   :  { %p556_p11 = por %p555_p10, %p554_p9 }
  0x1e   :  { %p557_p12 = pnand %p556_p11, %p550_p8 }
  0x85   :  { %v44_v2 = vpop.permute.xlu0 %43 }
  0x86   :  { %v45_v3 = vsel %vm42_vm0, %v44_v2, %v632_v0 }
  0x87   :  { %46 = vrot.lane.b32.xlu1 %v45_v3, %s576_s7 }
  0x89   :  { %v242_v4 = vpop.permute.xlu0 %241 }
  0x8a   :  { %v243_v5 = vsel %vm42_vm0, %v242_v4, %v639_v1 }
  0x8b   :  { %244 = vrot.lane.b32.xlu1 %v243_v5, %s576_s7 }
  0xf9   :  { %v47_v8 = vpop.permute.xlu1 %46 }
  0xfa   :  { %v48_v9 = vsel %vm42_vm0, %v47_v8, %v632_v0 }
  0xfb   :  { %52 = vrot.lane.b32.xlu0 %v48_v9, %s580_s0  ;;  %58 = vrot.lane.b32.xlu1 %v48_v9, %s581_s1 }
  0xfd   :  { %v245_v11 = vpop.permute.xlu1 %244 }
  0xfe   :  { %v246_v12 = vsel %vm42_vm0, %v245_v11, %v639_v1 }
  0xff   :  { %252 = vrot.lane.b32.xlu1 %v246_v12, %s581_s1  ;;  %248 = vrot.lane.b32.xlu0 %v246_v12, %s580_s0 }
 0x103   :  { %64 = vperm.xlu0 %526, %v39_v13  }
 0x16d   :  { %v53_v16 = vpop.permute.xlu0 %52  ;;  %v59_v22 = vpop.permute.xlu1 %58 }
 0x16e   :  { %v499_v18 = vpack.c.bf16 %v632_v0, %v53_v16 }
 0x170   :  { %501 = vmatpush3.bf16.msk.msra.mxu0 %vm669_vm4, %v499_v18 }
 0x171   :  { %466 = vmatprep.subr.mxu0 %v579_v7  ;;  %v249_v19 = vpop.permute.xlu0 %248  ;;  %v253_v23 = vpop.permute.xlu1 %252 }
 0x172   :  { %v507_v20 = vpack.c.bf16 %v639_v1, %v249_v19 }
 0x174   :  { %467 = vmatpush3.msk.msra.mxu0 %vm36_vm5, %v59_v22 }
 0x175   :  { %469 = vmatmul.mubr.msk.f32.vlgmr.msra.gmra.mrb[0].mxu0 %vm67_vm6, %v37_v21  ;;  %506 = vmatprep.subr.bf16.mxu0 %v577_v6 }
 0x176   :  { %509 = vmatpush3.bf16.msk.msra.mxu0 %vm669_vm4, %v507_v20  ;;  %486 = vmatprep.mubr.msk.f32.mxu0 %vm578_vm1, %v579_v7 }
 0x177   :  { %484 = vmatprep.subr.mxu0 %v579_v7 }
 0x17a   :  { %485 = vmatpush3.msk.msra.mxu0 %vm36_vm5, %v253_v23 }
 0x17b   :  { %487 = vmatmul.mubr.msk.f32.vlgmr.msra.gmra.mrb[2].mxu0 %vm67_vm6, %v37_v21 }
 0x182   :  { %v65_v24 = vpop.permute.xlu0 %64 }
 0x248   :  { %v137_v25 = vpop.f32.mrb[0].mxu0 }
 0x249   :  { %v138_v26 = vadd.f32 %v137_v25, %v65_v24  ;;  %v470_v27 = vpop.f32.mrb[1].mxu0 }
 0x24b   :  { %v141_v28 = vmax.f32 %v138_v26, 0.0 }
 0x24d   :  { %142 = vrot.lane.b32.xlu1 %v141_v28, %s576_s7 }
 0x24e   :  { %v322_v29 = vpop.f32.mrb[2].mxu0 }
 0x24f   :  { %v323_v30 = vadd.f32 %v322_v29, %v65_v24  ;;  %v488_v31 = vpop.f32.mrb[3].mxu0 }
 0x251   :  { %v326_v32 = vmax.f32 %v323_v30, 0.0 }
 0x253   :  { %327 = vrot.lane.b32.xlu1 %v326_v32, %s576_s7 }
 0x2bf   :  { %v143_v33 = vpop.permute.xlu1 %142 }
 0x2c0   :  { %v144_v34 = vsel %vm42_vm0, %v143_v33, %v141_v28 }
 0x2c1   :  { %145 = vrot.lane.b32.xlu0 %v144_v34, %s576_s7 }
 0x2c5   :  { %v328_v35 = vpop.permute.xlu1 %327 }
 0x2c6   :  { %v329_v36 = vsel %vm42_vm0, %v328_v35, %v326_v32 }
 0x2c7   :  { %330 = vrot.lane.b32.xlu1 %v329_v36, %s576_s7 }
 0x333   :  { %v146_v37 = vpop.permute.xlu0 %145 }
 0x334   :  { %v147_v38 = vsel %vm42_vm0, %v146_v37, %v141_v28 }
 0x335   :  { %149 = vrot.lane.b32.xlu0 %v147_v38, %s580_s0  ;;  %153 = vrot.lane.b32.xlu1 %v147_v38, %s581_s1 }
 0x339   :  { %v331_v39 = vpop.permute.xlu1 %330 }
 0x33a   :  { %v332_v40 = vsel %vm42_vm0, %v331_v39, %v326_v32 }
 0x33b   :  { %338 = vrot.lane.b32.xlu1 %v332_v40, %s581_s1  ;;  %334 = vrot.lane.b32.xlu0 %v332_v40, %s580_s0 }
 0x33f   :  { %159 = vperm.xlu0 %526, %v40_v41  }
 0x3a7   :  { %v150_v42 = vpop.permute.xlu0 %149  ;;  %v154_v45 = vpop.permute.xlu1 %153 }
 0x3a8   :  { %v503_v43 = vpack.c.bf16 %v141_v28, %v150_v42 }
 0x3aa   :  { %505 = vmatpush3.bf16.msk.msra.mxu1 %vm669_vm4, %v503_v43 }
 0x3ab   :  { %475 = vmatprep.subr.mxu1 %v579_v7 }
 0x3ad   :  { %v335_v46 = vpop.permute.xlu0 %334  ;;  %v339_v48 = vpop.permute.xlu1 %338 }
 0x3ae   :  { %v511_v47 = vpack.c.bf16 %v326_v32, %v335_v46  ;;  %476 = vmatpush3.msk.msra.mxu1 %vm36_vm5, %v154_v45 }
 0x3af   :  { %478 = vmatmul.mubr.msk.f32.vlgmr.msra.gmra.mrb[0].mxu1 %vm67_vm6, %v38_v44  ;;  %510 = vmatprep.subr.bf16.mxu1 %v577_v6 }
 0x3b0   :  { %513 = vmatpush3.bf16.msk.msra.mxu1 %vm669_vm4, %v511_v47  ;;  %495 = vmatprep.mubr.msk.f32.mxu1 %vm578_vm1, %v579_v7 }
 0x3b1   :  { %493 = vmatprep.subr.mxu1 %v579_v7 }
 0x3b4   :  { %494 = vmatpush3.msk.msra.mxu1 %vm36_vm5, %v339_v48 }
 0x3b5   :  { %496 = vmatmul.mubr.msk.f32.vlgmr.msra.gmra.mrb[2].mxu1 %vm67_vm6, %v38_v44 }
 0x3be   :  { %v160_v49 = vpop.permute.xlu0 %159 }
 0x482   :  { %v231_v50 = vpop.f32.mrb[0].mxu1 }
 0x483   :  { %v232_v51 = vadd.f32 %v231_v50, %v160_v49  ;;  %v479_v52 = vpop.f32.mrb[1].mxu1 }
 0x485   :  { %v235_v53 = vadd.f32 %v232_v51, %v632_v0 }
 0x487   :  { %v236_v54 = vmax.f32 %v235_v53, 0.0 }
 0x488   :  { %v408_v55 = vpop.f32.mrb[2].mxu1 }
 0x489   :  { %238 = vst.msk [vmem:[#allocation5] sm:$0xff] %vm237_vm7, %v236_v54  ;;  %v409_v56 = vadd.f32 %v408_v55, %v160_v49  ;;  %v497_v57 = vpop.f32.mrb[3].mxu1 }
 0x48b   :  { %v412_v58 = vadd.f32 %v639_v1, %v409_v56 }
 0x48d   :  { %v413_v59 = vmax.f32 %v412_v58, 0.0 }
 0x48f   :  { %415 = vst.msk [vmem:[#allocation5 + $0x8] sm:$0xff] %vm237_vm7, %v413_v59 }
 0x490   :  { %560 = shalt.err (!%p557_p12)
}
 0x491   :  { %s561_s18 = scalar_lea.hbm %s743_s5, 256 }
 0x492   :  { %p562_p13 = scmp.ne.s32.totalorder %s743_s5, %s561_s18  ;;  %p565_p0 = scmp.lt.u32.totalorder %s561_s18, %s743_s5 }
 0x494   :  { %p567_p1 = pnand %p565_p0, %p562_p13 }
 0x496   :  { %570 = shalt.err (!%p567_p1)
}
 0x497   :  { %s585_s23 = smov 128   ;;  %s586_s24 = smov 8  }
 0x498   :  { %427 = dma.vmem_to_hbm [thread:$0]  %s422_s4, 256, %s743_s5, [#allocation4], %s585_s23, %s585_s23, %s586_s24  }
 0x499   :  { %573 = dma.done.wait [#allocation4], 256  }
 0x49a   :  { %574 = vsyncadd [#allocation4], 4294967040 }
 0x49b   :  { %431 = vsyncpa [#allocation3], 1 }
 0x49c   :  { %432 = vsyncpa [#allocation4], 1 }

</bundles_post_ra>
